<compile_context>
chip_gen: v5e
topology: v5e:2x2
jax: 0.10.0
libtpu: 0.0.40
codegen_flags: <defaults>
</compile_context>

<pallas_src>
import functools

import jax
import jax.numpy as jnp
from jax.experimental import pallas as pl
from jax.experimental.pallas import tpu as pltpu

_LANES = 128


def _outconv_kernel(x_ref, w_ref, b_ref, o_ref):
    # x_ref: (1, Ci, TR, 128) VMEM   w_ref: (Co, Ci) SMEM   b_ref: (Co,) SMEM
    # o_ref: (1, Co, TR, 128) VMEM
    ci_total = x_ref.shape[1]
    co_total = o_ref.shape[1]
    # Load each input channel tile once; re-use across all output channels.
    xs = [x_ref[0, ci, :, :].astype(jnp.float32) for ci in range(ci_total)]
    for co in range(co_total):  # tiny Co/Ci -> fully unrolled VPU FMAs
        acc = xs[0] * w_ref[co, 0]
        for ci in range(1, ci_total):
            acc = acc + xs[ci] * w_ref[co, ci]
        o_ref[0, co, :, :] = jax.nn.sigmoid(acc + b_ref[co]).astype(o_ref.dtype)


@functools.partial(jax.jit, static_argnames=("vmem_block_budget",))
def outconv_forward(x, weight, bias, vmem_block_budget=8 * 1024 * 1024):
    """x: (N, Ci, D, H, W); weight: (Co, Ci, 1, 1, 1); bias: (Co,). Returns (N, Co, D, H, W)."""
    N, Ci, D, H, W = x.shape
    Co = weight.shape[0]
    S = D * H * W

    # Free reshapes only (contiguous): channels stay second, spatial flattened last.
    x3 = x.reshape(N, Ci, S)
    S_pad = pl.cdiv(S, _LANES) * _LANES
    if S_pad != S:
        # TODO(synk): only hit when D*H*W is not a multiple of 128; costs one extra HBM pass.
        x3 = jnp.pad(x3, ((0, 0), (0, 0), (0, S_pad - S)))
    R = S_pad // _LANES
    x4 = x3.reshape(N, Ci, R, _LANES)

    # Row tile (each row = 128 voxels).  Pick the biggest tile whose
    # double-buffered input+output blocks fit the VMEM budget; this amortizes
    # the per-grid-step overhead against multi-MiB of HBM traffic per step.
    itemsize = jnp.dtype(x.dtype).itemsize
    row_bytes = _LANES * (Ci + Co) * itemsize          # one 128-voxel row, in+out
    tr_budget = max(1, vmem_block_budget // (2 * row_bytes))  # x2: double buffering
    if R <= tr_budget:
        tr = R                                          # full extent is always legal
    else:
        tr = max(8, (min(tr_budget, R) // 8) * 8)       # (8,128) block constraint

    w2d = weight.reshape(Co, Ci).astype(jnp.float32)    # tiny -> SMEM scalars
    b1 = bias.reshape(Co).astype(jnp.float32)

    grid = (N, pl.cdiv(R, tr))
    out4 = pl.pallas_call(
        _outconv_kernel,
        out_shape=jax.ShapeDtypeStruct((N, Co, R, _LANES), x.dtype),
        grid_spec=pltpu.PrefetchScalarGridSpec(
            num_scalar_prefetch=0,
            grid=grid,
            in_specs=[
                pl.BlockSpec((1, Ci, tr, _LANES), lambda n, r: (n, 0, r, 0)),
                pl.BlockSpec(memory_space=pltpu.MemorySpace.SMEM),
                pl.BlockSpec(memory_space=pltpu.MemorySpace.SMEM),
            ],
            out_specs=pl.BlockSpec((1, Co, tr, _LANES), lambda n, r: (n, 0, r, 0)),
        ),
        compiler_params=pltpu.CompilerParams(
            dimension_semantics=("parallel", "parallel"),
        ),
    )(x4, w2d, b1)

    out = out4.reshape(N, Co, S_pad)
    if S_pad != S:
        out = out[:, :, :S]
    return out.reshape(N, Co, D, H, W)  # free reshape, no transpose


def _reference(x, weight, bias):
    Co, Ci = weight.shape[0], weight.shape[1]
    return jax.nn.sigmoid(
        jnp.einsum("ncdhw,oc->nodhw", x, weight.reshape(Co, Ci))
        + bias.reshape(1, Co, 1, 1, 1)
    )


if __name__ == "__main__":
    key = jax.random.PRNGKey(0)
    kx, kw, kb, kx2 = jax.random.split(key, 4)

    # Main case: N=2, Ci=4, Co=2, D=H=W=8  (S = 512, multiple of 128: fast path)
    N, Ci, Co, D, H, W = 2, 4, 2, 8, 8, 8
    x = jax.random.normal(kx, (N, Ci, D, H, W), dtype=jnp.float32)
    weight = jax.random.normal(kw, (Co, Ci, 1, 1, 1), dtype=jnp.float32) * 0.1
    bias = jax.random.normal(kb, (Co,), dtype=jnp.float32) * 0.1

    y = outconv_forward(x, weight, bias)
    jax.block_until_ready(y)
    assert y.shape == (N, Co, D, H, W)
    assert jnp.allclose(y, _reference(x, weight, bias), atol=1e-5, rtol=1e-5)

    # Ragged case: spatial not a multiple of 128 (exercises the padded path).
    x2 = jax.random.normal(kx2, (N, Ci, 3, 5, 5), dtype=jnp.float32)
    y2 = outconv_forward(x2, weight, bias)
    jax.block_until_ready(y2)
    assert y2.shape == (N, Co, 3, 5, 5)
    assert jnp.allclose(y2, _reference(x2, weight, bias), atol=1e-5, rtol=1e-5)

    print("KERNEL_OK")
</pallas_src>

<mosaic_0001>
module attributes {stable_mosaic.version = 11 : i64} {
  func.func @_outconv_kernel(%arg0: i32, %arg1: i32, %arg2: memref<1x4x4x128xf32, #tpu.memory_space<vmem>>, %arg3: memref<2x4xf32, #tpu.memory_space<smem>>, %arg4: memref<2xf32, #tpu.memory_space<smem>>, %arg5: memref<1x2x4x128xf32, #tpu.memory_space<vmem>>) attributes {dimension_semantics = [#tpu.dimension_semantics<parallel>, #tpu.dimension_semantics<parallel>], iteration_bounds = array<i64: 2, 1>, scalar_prefetch = 0 : i64, scratch_operands = 0 : i64, tpu.core_type = #tpu.core_type<tc>, window_params = [{transform_indices = @transform_0, window_bounds = array<i64: 1, 4, 4, 128>}, {transform_indices = @transform_1, window_bounds = array<i64: 2, 4>}, {transform_indices = @transform_2, window_bounds = array<i64: 2>}, {transform_indices = @transform_3, window_bounds = array<i64: 1, 2, 4, 128>}]} {
    %c0 = arith.constant 0 : index
    %c0_0 = arith.constant 0 : index
    %c0_1 = arith.constant 0 : index
    %c0_2 = arith.constant 0 : index
    %0 = vector.load %arg2[%c0, %c0_0, %c0_1, %c0_2] : memref<1x4x4x128xf32, #tpu.memory_space<vmem>>, vector<1x1x4x128xf32>
    %1 = vector.shape_cast %0 : vector<1x1x4x128xf32> to vector<4x128xf32>
    %c0_3 = arith.constant 0 : index
    %c1 = arith.constant 1 : index
    %c0_4 = arith.constant 0 : index
    %c0_5 = arith.constant 0 : index
    %2 = vector.load %arg2[%c0_3, %c1, %c0_4, %c0_5] : memref<1x4x4x128xf32, #tpu.memory_space<vmem>>, vector<1x1x4x128xf32>
    %3 = vector.shape_cast %2 : vector<1x1x4x128xf32> to vector<4x128xf32>
    %c0_6 = arith.constant 0 : index
    %c2 = arith.constant 2 : index
    %c0_7 = arith.constant 0 : index
    %c0_8 = arith.constant 0 : index
    %4 = vector.load %arg2[%c0_6, %c2, %c0_7, %c0_8] : memref<1x4x4x128xf32, #tpu.memory_space<vmem>>, vector<1x1x4x128xf32>
    %5 = vector.shape_cast %4 : vector<1x1x4x128xf32> to vector<4x128xf32>
    %c0_9 = arith.constant 0 : index
    %c3 = arith.constant 3 : index
    %c0_10 = arith.constant 0 : index
    %c0_11 = arith.constant 0 : index
    %6 = vector.load %arg2[%c0_9, %c3, %c0_10, %c0_11] : memref<1x4x4x128xf32, #tpu.memory_space<vmem>>, vector<1x1x4x128xf32>
    %7 = vector.shape_cast %6 : vector<1x1x4x128xf32> to vector<4x128xf32>
    %c0_12 = arith.constant 0 : index
    %c0_13 = arith.constant 0 : index
    %8 = memref.load %arg3[%c0_12, %c0_13] : memref<2x4xf32, #tpu.memory_space<smem>>
    %9 = vector.broadcast %8 : f32 to vector<4x128xf32>
    %10 = arith.mulf %1, %9 : vector<4x128xf32>
    %c0_14 = arith.constant 0 : index
    %c1_15 = arith.constant 1 : index
    %11 = memref.load %arg3[%c0_14, %c1_15] : memref<2x4xf32, #tpu.memory_space<smem>>
    %12 = vector.broadcast %11 : f32 to vector<4x128xf32>
    %13 = arith.mulf %3, %12 : vector<4x128xf32>
    %14 = arith.addf %10, %13 : vector<4x128xf32>
    %c0_16 = arith.constant 0 : index
    %c2_17 = arith.constant 2 : index
    %15 = memref.load %arg3[%c0_16, %c2_17] : memref<2x4xf32, #tpu.memory_space<smem>>
    %16 = vector.broadcast %15 : f32 to vector<4x128xf32>
    %17 = arith.mulf %5, %16 : vector<4x128xf32>
    %18 = arith.addf %14, %17 : vector<4x128xf32>
    %c0_18 = arith.constant 0 : index
    %c3_19 = arith.constant 3 : index
    %19 = memref.load %arg3[%c0_18, %c3_19] : memref<2x4xf32, #tpu.memory_space<smem>>
    %20 = vector.broadcast %19 : f32 to vector<4x128xf32>
    %21 = arith.mulf %7, %20 : vector<4x128xf32>
    %22 = arith.addf %18, %21 : vector<4x128xf32>
    %c0_20 = arith.constant 0 : index
    %23 = memref.load %arg4[%c0_20] : memref<2xf32, #tpu.memory_space<smem>>
    %24 = vector.broadcast %23 : f32 to vector<4x128xf32>
    %25 = arith.addf %22, %24 : vector<4x128xf32>
    %26 = arith.negf %25 : vector<4x128xf32>
    %27 = math.exp %26 : vector<4x128xf32>
    %cst = arith.constant 1.000000e+00 : f32
    %28 = vector.broadcast %cst : f32 to vector<4x128xf32>
    %29 = arith.addf %28, %27 : vector<4x128xf32>
    %30 = arith.divf %28, %29 : vector<4x128xf32>
    %c0_21 = arith.constant 0 : index
    %c0_22 = arith.constant 0 : index
    %c0_23 = arith.constant 0 : index
    %c0_24 = arith.constant 0 : index
    %31 = vector.load %arg5[%c0_21, %c0_22, %c0_23, %c0_24] : memref<1x2x4x128xf32, #tpu.memory_space<vmem>>, vector<1x1x4x128xf32>
    %32 = vector.shape_cast %31 : vector<1x1x4x128xf32> to vector<4x128xf32>
    %33 = vector.shape_cast %30 : vector<4x128xf32> to vector<1x1x4x128xf32>
    tpu.vector_store %arg5[%c0_21, %c0_22, %c0_23, %c0_24], %33 {strides = array<i32>} : memref<1x2x4x128xf32, #tpu.memory_space<vmem>>, vector<1x1x4x128xf32>,
    %c1_25 = arith.constant 1 : index
    %c0_26 = arith.constant 0 : index
    %34 = memref.load %arg3[%c1_25, %c0_26] : memref<2x4xf32, #tpu.memory_space<smem>>
    %35 = vector.broadcast %34 : f32 to vector<4x128xf32>
    %36 = arith.mulf %1, %35 : vector<4x128xf32>
    %c1_27 = arith.constant 1 : index
    %c1_28 = arith.constant 1 : index
    %37 = memref.load %arg3[%c1_27, %c1_28] : memref<2x4xf32, #tpu.memory_space<smem>>
    %38 = vector.broadcast %37 : f32 to vector<4x128xf32>
    %39 = arith.mulf %3, %38 : vector<4x128xf32>
    %40 = arith.addf %36, %39 : vector<4x128xf32>
    %c1_29 = arith.constant 1 : index
    %c2_30 = arith.constant 2 : index
    %41 = memref.load %arg3[%c1_29, %c2_30] : memref<2x4xf32, #tpu.memory_space<smem>>
    %42 = vector.broadcast %41 : f32 to vector<4x128xf32>
    %43 = arith.mulf %5, %42 : vector<4x128xf32>
    %44 = arith.addf %40, %43 : vector<4x128xf32>
    %c1_31 = arith.constant 1 : index
    %c3_32 = arith.constant 3 : index
    %45 = memref.load %arg3[%c1_31, %c3_32] : memref<2x4xf32, #tpu.memory_space<smem>>
    %46 = vector.broadcast %45 : f32 to vector<4x128xf32>
    %47 = arith.mulf %7, %46 : vector<4x128xf32>
    %48 = arith.addf %44, %47 : vector<4x128xf32>
    %c1_33 = arith.constant 1 : index
    %49 = memref.load %arg4[%c1_33] : memref<2xf32, #tpu.memory_space<smem>>
    %50 = vector.broadcast %49 : f32 to vector<4x128xf32>
    %51 = arith.addf %48, %50 : vector<4x128xf32>
    %52 = arith.negf %51 : vector<4x128xf32>
    %53 = math.exp %52 : vector<4x128xf32>
    %cst_34 = arith.constant 1.000000e+00 : f32
    %54 = vector.broadcast %cst_34 : f32 to vector<4x128xf32>
    %55 = arith.addf %54, %53 : vector<4x128xf32>
    %56 = arith.divf %54, %55 : vector<4x128xf32>
    %c0_35 = arith.constant 0 : index
    %c1_36 = arith.constant 1 : index
    %c0_37 = arith.constant 0 : index
    %c0_38 = arith.constant 0 : index
    %57 = vector.load %arg5[%c0_35, %c1_36, %c0_37, %c0_38] : memref<1x2x4x128xf32, #tpu.memory_space<vmem>>, vector<1x1x4x128xf32>
    %58 = vector.shape_cast %57 : vector<1x1x4x128xf32> to vector<4x128xf32>
    %59 = vector.shape_cast %56 : vector<4x128xf32> to vector<1x1x4x128xf32>
    tpu.vector_store %arg5[%c0_35, %c1_36, %c0_37, %c0_38], %59 {strides = array<i32>} : memref<1x2x4x128xf32, #tpu.memory_space<vmem>>, vector<1x1x4x128xf32>,
    return
  }
  func.func @transform_0(%arg0: i32, %arg1: i32) -> (i32, i32, i32, i32) {
    %c0_i32 = arith.constant 0 : i32
    %c0_i32_0 = arith.constant 0 : i32
    %c0_i32_1 = arith.constant 0 : i32
    return %arg0, %c0_i32, %arg1, %c0_i32_0 : i32, i32, i32, i32
  }
  func.func @transform_1(%arg0: i32, %arg1: i32) -> (i32, i32) {
    %c0_i32 = arith.constant 0 : i32
    %c0_i32_0 = arith.constant 0 : i32
    %c0_i32_1 = arith.constant 0 : i32
    return %c0_i32, %c0_i32_0 : i32, i32
  }
  func.func @transform_2(%arg0: i32, %arg1: i32) -> i32 {
    %c0_i32 = arith.constant 0 : i32
    %c0_i32_0 = arith.constant 0 : i32
    return %c0_i32 : i32
  }
  func.func @transform_3(%arg0: i32, %arg1: i32) -> (i32, i32, i32, i32) {
    %c0_i32 = arith.constant 0 : i32
    %c0_i32_0 = arith.constant 0 : i32
    %c0_i32_1 = arith.constant 0 : i32
    return %arg0, %c0_i32, %arg1, %c0_i32_0 : i32, i32, i32, i32
  }
}

</mosaic_0001>

<bundles_post_ra>
// kernel: outconv_forward.1
= control target key start
LH: loop header
LB: loop body
LE: loop exit
PB: predicated region body
PF: predicated region fallthrough
CT: control target
= control target key end

     0   :  { %8 = vsyncpa [#allocation3], 0  ;;  %s649_s0 = inlined_call_operand.vmem [shape: f32[2,4,4,128], index: 0, kind: input, shape index: {}]   ;;  %s650_s1 = inlined_call_operand.vmem [shape: f32[2,4], index: 1, kind: input, shape index: {}]   ;;  %s651_s2 = inlined_call_operand.vmem [shape: f32[2], index: 2, kind: input, shape index: {}]   ;;  %s652_s3 = inlined_call_operand.vmem [shape: f32[2,2,4,128], index: 3, kind: output, shape index: {}]  }
   0x1   :  { %9 = vsyncpa [#allocation5], 0  ;;  %s587_s12 = smov 0   ;;  %s589_s13 = smov 0  }
   0x2   :  { %s591_s14 = smov 0  }
   0x3 LB: > { %s419_s15 = sadd.s32 4294967295, %s563_s14   ;;  %s27_s16 = sadd.s32 1, %s559_s13  ;;  %s563_s14 = sphi %s591_s14, %s15_s14   ;;  %s559_s13 = sphi %s589_s13, %s655_s13   ;;  %s555_s12 = sphi %s587_s12, %s654_s12  }
   0x4   : > { %p29_p0 = scmp.ge.s32.totalorder %s27_s16, 2  ;;  %p421_p1 = scmp.ge.s32.totalorder %s563_s14, 1 }
   0x5   : > { %p130_p2 = scmp.lt.s32.totalorder %s563_s14, 3  ;;  %p608_p4 = scmp.eq.s32.totalorder %s419_s15, 0 }
   0x6   : > { %s657_s16 = smov (%p29_p0, %s27_s16), 0  ;;  %s142_s20 = sshll.u32 %s650_s1, 4  ;;  %s143_s20 = int_to_ptr.vmem [resolvable:$true] %s142_s20 }
   0x7   : > { %p131_p3 = pnand %p421_p1, %p130_p2  ;;  %s152_s23 = sshll.u32 %s651_s2, 4  ;;  %s153_s23 = int_to_ptr.vmem [resolvable:$true] %s152_s23 }
   0x8   : > { %s565_s24 = smov [#allocation2]   ;;  %s566_s25 = smov [#allocation4]  }
   0x9   : > { %p458_p5 = pneg %p131_p3 }
   0xa   : > { %176 = sbr.rel (%p131_p3) target bundleno = 73 (0x49), region = 32 }
   0xb   : > { %p459_p6 = pnand %p608_p4, %p458_p5 }
   0xd   : > { %461 = dma.vmem_to_smem (!%p459_p6), %s143_s20, 32, %s565_s24, [#allocation3]  }
   0xe   : > { %464 = dma.vmem_to_smem (!%p459_p6), %s153_s23, 16, %s566_s25, [#allocation5]  }
   0xf   : > { %546 = dma.done.wait (%p608_p4), [#allocation3], 32  }
  0x10   : > { %548 = vsyncadd (%p608_p4), [#allocation3], 4294967264 }
  0x11   : > { %550 = dma.done.wait (%p608_p4), [#allocation5], 16  }
  0x12   : > { %552 = vsyncadd (%p608_p4), [#allocation5], 4294967280 }
  0x13   : > { %188 = sfence }
  0x14   : > { %p213_p7 = scmp.lt.s32.totalorder %s555_s12, 1  ;;  %s236_s26 = sld [smem:[#allocation2]] }
  0x15   : > { %s435_s27 = sld [smem:[#allocation2 + $0x1]] }
  0x16   : > { %s659_s12 = smov (!%p213_p7, %s555_s12), 1  ;;  %s436_s28 = sld [smem:[#allocation2 + $0x2]] }
  0x17   : > { %s448_s29 = sshll.u32 %s659_s12, 4  ;;  %s437_s6 = sld [smem:[#allocation2 + $0x3]] }
  0x18   : > { %s220_s5 = scalar_lea.vmem %s649_s0, %s448_s29  ;;  %s251_s7 = sld [smem:[#allocation4]] }
  0x19   : > { %v229_v0 = vld [vmem:[%s220_s5] sm:$0xf]  ;;  %v432_v1 = vld [vmem:[%s220_s5 + $0x4] sm:$0xf]  ;;  %v433_v3 = vld [vmem:[%s220_s5 + $0x8] sm:$0xf] }
  0x1a   : > { %v237_v2 = vstv %s236_s26  ;;  %s439_s8 = sld [smem:[#allocation2 + $0x80]]  ;;  %v434_v10 = vld [vmem:[%s220_s5 + $0xc] sm:$0xf]  ;;  %s449_s17 = sshll.u32 %s659_s12, 3 }
  0x1b   : > { %v238_v4 = vmul.f32 %v237_v2, %v229_v0  ;;  %v240_v5 = vstv %s435_s27  ;;  %s440_s9 = sld [smem:[#allocation2 + $0x81]]  ;;  %s228_s20 = scalar_lea.vmem %s652_s3, %s449_s17 }
  0x1c   : > { %v241_v6 = vmul.f32 %v432_v1, %v240_v5  ;;  %v244_v7 = vstv %s436_s28  ;;  %s441_s10 = sld [smem:[#allocation2 + $0x82]] }
  0x1d   : > { %v245_v9 = vmul.f32 %v433_v3, %v244_v7  ;;  %s442_s11 = sld [smem:[#allocation2 + $0x83]]  ;;  %v248_v12 = vstv %s437_s6 }
  0x1e   : > { %v242_v8 = vadd.f32 %v241_v6, %v238_v4  ;;  %v249_v13 = vmul.f32 %v434_v10, %v248_v12  ;;  %s443_s15 = sld [smem:[#allocation4 + $0x1]]  ;;  %v252_v14 = vstv %s251_s7 }
  0x20   : > { %v246_v11 = vadd.f32 %v245_v9, %v242_v8  ;;  %v275_v15 = vstv %s439_s8 }
  0x21   : > { %v276_v17 = vmul.f32 %v275_v15, %v229_v0  ;;  %v278_v18 = vstv %s440_s9 }
  0x22   : > { %v250_v16 = vadd.f32 %v249_v13, %v246_v11  ;;  %v279_v19 = vmul.f32 %v432_v1, %v278_v18  ;;  %v282_v20 = vstv %s441_s10 }
  0x23   : > { %v283_v22 = vmul.f32 %v433_v3, %v282_v20  ;;  %v286_v23 = vstv %s442_s11 }
  0x24   : > { %v253_v21 = vadd.f32 %v252_v14, %v250_v16  ;;  %v280_v24 = vadd.f32 %v279_v19, %v276_v17  ;;  %v287_v25 = vmul.f32 %v434_v10, %v286_v23  ;;  %v290_v28 = vstv %s443_s15 }
  0x26   : > { %v438_v26 = vmul.f32 -1.442695, %v253_v21  ;;  %v284_v27 = vadd.f32 %v283_v22, %v280_v24 }
  0x28   : > { %495 = vpow2.f32 %v438_v26  ;;  %v288_v29 = vadd.f32 %v287_v25, %v284_v27 }
  0x2a   : > { %v291_v30 = vadd.f32 %v290_v28, %v288_v29 }
  0x2c   : > { %v444_v31 = vmul.f32 -1.442695, %v291_v30 }
  0x2e   : > { %v496_v32 = vpop.eup %495  ;;  %497 = vpow2.f32 %v444_v31 }
  0x2f   : > { %v257_v33 = vadd.f32 1.0, %v496_v32 }
  0x31   : > { %499 = vrcp.f32 %v257_v33  ;;  %v269_v38 = vand.u32 2147483648, %v257_v33  ;;  %vm263_vm0 = vweird.f32 %v257_v33  ;;  %v267_v40 = vand.u32 2147483647, %v257_v33 }
  0x33   : > { %v270_v42 = vor.u32 1.1754944e-38, %v269_v38  ;;  %vm268_vm3 = vcmp.eq.f32.partialorder %v267_v40, 8.507059e+37 }
  0x34   : > { %v498_v34 = vpop.eup %497 }
  0x35   : > { %v295_v35 = vadd.f32 1.0, %v498_v34 }
  0x37   : > { %v500_v36 = vpop.eup %499  ;;  %501 = vrcp.f32 %v295_v35  ;;  %vm301_vm4 = vweird.f32 %v295_v35  ;;  %v307_v47 = vand.u32 2147483648, %v295_v35  ;;  %v305_v50 = vand.u32 2147483647, %v295_v35 }
  0x38   : > { %v259_v37 = vmul.f32 %v500_v36, %v257_v33  ;;  %vm264_vm1 = vweird.f32 %v500_v36 }
  0x39   : > { %vm265_vm2 = vmor %vm263_vm0, %vm264_vm1  ;;  %v308_v52 = vor.u32 1.1754944e-38, %v307_v47  ;;  %vm306_vm7 = vcmp.eq.f32.partialorder %v305_v50, 8.507059e+37 }
  0x3a   : > { %v260_v39 = vsub.f32 1.0, %v259_v37 }
  0x3c   : > { %v261_v41 = vmul.f32 %v500_v36, %v260_v39 }
  0x3d   : > { %v502_v43 = vpop.eup %501 }
  0x3e   : > { %v262_v44 = vadd.f32 %v500_v36, %v261_v41  ;;  %v297_v45 = vmul.f32 %v502_v43, %v295_v35  ;;  %vm302_vm5 = vweird.f32 %v502_v43 }
  0x3f   : > { %vm303_vm6 = vmor %vm301_vm4, %vm302_vm5 }
  0x40   : > { %v266_v46 = vsel %vm265_vm2, %v500_v36, %v262_v44  ;;  %v298_v49 = vsub.f32 1.0, %v297_v45 }
  0x41   : > { %v271_v48 = vsel %vm268_vm3, %v270_v42, %v266_v46 }
  0x42   : > { %273 = vst [vmem:[%s228_s20] sm:$0xf] %v271_v48  ;;  %v299_v51 = vmul.f32 %v502_v43, %v298_v49 }
  0x44   : > { %v300_v53 = vadd.f32 %v502_v43, %v299_v51 }
  0x46   : > { %v304_v54 = vsel %vm303_vm6, %v502_v43, %v300_v53 }
  0x47   : > { %v309_v55 = vsel %vm306_vm7, %v308_v52, %v304_v54 }
  0x48   : > { %445 = vst [vmem:[%s228_s20 + $0x4] sm:$0xf] %v309_v55 }
  0x49 PF: > { %s15_s14 = sadd.s32 1, %s563_s14   ;;  %s654_s12 = smov %s559_s13 }
  0x4a   : > { %p12_p8 = scmp.ge.s32.totalorder %s15_s14, 4   ;;  %s655_s13 = smov %s657_s16 }
  0x4c   :  { %14 = sbr.rel (!%p12_p8) target bundleno = 3 (0x3), region = 75 }
  0x51   :  { %340 = vsyncpa [#allocation3], 1 }
  0x52   :  { %342 = vsyncpa [#allocation3 + $0x1], 1 }
  0x53   :  { %343 = vsyncpa [#allocation5], 1 }

</bundles_post_ra>
